<compile_context>
chip_gen: v7x
topology: tpu7x:2x2x1
jax: 0.10.0
libtpu: 0.0.40
codegen_flags: <defaults>
</compile_context>

<pallas_src>
import functools

import jax
import jax.numpy as jnp
from jax import lax
from jax.experimental import pallas as pl
from jax.experimental.pallas import tpu as pltpu


def _round_up(x, m):
    return ((x + m - 1) // m) * m


def _softbce_kernel(l1_ref, l2_ref, simi_ref, out_ref, acc_ref, *, n_rows, tile_n):
    i = pl.program_id(0)

    @pl.when(i == 0)
    def _():
        acc_ref[...] = jnp.zeros_like(acc_ref)

    l1 = l1_ref[...].astype(jnp.float32)       # (tile_n, C)
    l2 = l2_ref[...].astype(jnp.float32)       # (tile_n, C)
    y = simi_ref[...].astype(jnp.float32)      # (tile_n, 1)

    # pair logits: per-row dot product (sum over the channel axis, dim=1).
    x = jnp.sum(l1 * l2, axis=1, keepdims=True)          # (tile_n, 1)

    # Mask rows beyond the true N (the remainder tile holds padded rows).
    row = i * tile_n + lax.broadcasted_iota(jnp.int32, (tile_n, 1), 0)
    valid = row < n_rows
    x = jnp.where(valid, x, 0.0)
    y = jnp.where(valid, y, 0.0)

    # Numerically stable BCE-with-logits: max(x,0) - x*y + log1p(exp(-|x|)).
    per = jnp.maximum(x, 0.0) - x * y + jnp.log1p(jnp.exp(-jnp.abs(x)))
    per = jnp.where(valid, per, 0.0)           # masked rows contribute 0

    acc_ref[...] = acc_ref[...] + jnp.sum(per)

    @pl.when(i == pl.num_programs(0) - 1)
    def _():
        out_ref[...] = acc_ref[...] * jnp.float32(1.0 / n_rows)


def soft_bce(logits1, logits2, simi, *, tile_n=None):
    """softBCE(use_logits=True): mean BCEWithLogits over row-wise dot products.

    logits1, logits2: (N, C) features (f32 or bf16); simi: (N,) soft labels.
    Returns a scalar f32 loss.
    """
    N, C = logits1.shape
    assert logits2.shape == (N, C)
    assert simi.shape == (N,)

    if tile_n is None:
        itemsize = max(jnp.dtype(logits1.dtype).itemsize,
                       jnp.dtype(logits2.dtype).itemsize)
        # 2 inputs x 2 pipeline buffers per tile; keep well under scoped VMEM.
        budget_bytes = 8 * 1024 * 1024
        tile_n = budget_bytes // max(1, 4 * C * itemsize)
        tile_n = min(tile_n, 2048)

    tile_n = max(8, (int(tile_n) // 8) * 8)    # sublane multiple of 8
    if tile_n >= N:
        tile_n = N                             # single full-extent block is legal

    num_tiles = pl.cdiv(N, tile_n)
    simi_2d = simi.reshape(N, 1)

    in_bytes = (logits1.size * jnp.dtype(logits1.dtype).itemsize
                + logits2.size * jnp.dtype(logits2.dtype).itemsize
                + simi_2d.size * jnp.dtype(simi_2d.dtype).itemsize)
    cost = pl.CostEstimate(
        flops=2 * N * C + 5 * N,
        transcendentals=2 * N,
        bytes_accessed=int(in_bytes) + 4,
    )

    kernel = functools.partial(_softbce_kernel, n_rows=N, tile_n=tile_n)

    out = pl.pallas_call(
        kernel,
        out_shape=jax.ShapeDtypeStruct((1, 1), jnp.float32),
        grid_spec=pltpu.PrefetchScalarGridSpec(
            num_scalar_prefetch=0,
            grid=(num_tiles,),
            in_specs=[
                pl.BlockSpec((tile_n, C), lambda i: (i, 0)),
                pl.BlockSpec((tile_n, C), lambda i: (i, 0)),
                pl.BlockSpec((tile_n, 1), lambda i: (i, 0)),
            ],
            out_specs=pl.BlockSpec((1, 1), lambda i: (0, 0)),
            scratch_shapes=[pltpu.VMEM((1, 1), jnp.float32)],
        ),
        compiler_params=pltpu.CompilerParams(
            # Resident accumulator => grid axis must stay serial.
            dimension_semantics=("arbitrary",),
            vmem_limit_bytes=48 * 1024 * 1024,
        ),
        cost_estimate=cost,
    )(logits1, logits2, simi_2d)
    return out[0, 0]


def _reference(logits1, logits2, simi):
    x = jnp.sum(logits1.astype(jnp.float32) * logits2.astype(jnp.float32), axis=1)
    y = simi.astype(jnp.float32)
    per = jnp.maximum(x, 0.0) - x * y + jnp.log1p(jnp.exp(-jnp.abs(x)))
    return jnp.mean(per)


if __name__ == "__main__":
    key = jax.random.PRNGKey(0)
    k1, k2, k3 = jax.random.split(key, 3)

    # Small shapes consistent with the module: N feature pairs of dim D.
    N, C = 20, 32
    logits1 = jax.random.normal(k1, (N, C), dtype=jnp.float32)
    logits2 = jax.random.normal(k2, (N, C), dtype=jnp.float32)
    simi = jax.random.uniform(k3, (N,), dtype=jnp.float32)   # soft labels in [0, 1]

    ref = _reference(logits1, logits2, simi)

    # Multi-tile path with a remainder tile (N=20, tile_n=8 -> 3 tiles, masked tail).
    loss_tiled = soft_bce(logits1, logits2, simi, tile_n=8)
    jax.block_until_ready(loss_tiled)
    assert jnp.allclose(loss_tiled, ref, rtol=1e-5, atol=1e-5), (loss_tiled, ref)

    # Auto-sized tile path (single full-extent block at this small N).
    loss_auto = soft_bce(logits1, logits2, simi)
    jax.block_until_ready(loss_auto)
    assert jnp.allclose(loss_auto, ref, rtol=1e-5, atol=1e-5), (loss_auto, ref)

    # bf16 inputs: half the HBM traffic; f32 accumulation inside the kernel.
    l1_bf = logits1.astype(jnp.bfloat16)
    l2_bf = logits2.astype(jnp.bfloat16)
    loss_bf16 = soft_bce(l1_bf, l2_bf, simi, tile_n=16)
    jax.block_until_ready(loss_bf16)
    ref_bf16 = _reference(l1_bf, l2_bf, simi)
    assert jnp.allclose(loss_bf16, ref_bf16, rtol=1e-3, atol=1e-3), (loss_bf16, ref_bf16)

    print("KERNEL_OK")
</pallas_src>

<mosaic_0001>
module attributes {stable_mosaic.version = 11 : i64} {
  func.func @_softbce_kernel(%arg0: i32, %arg1: memref<8x32xf32, #tpu.memory_space<vmem>>, %arg2: memref<8x32xf32, #tpu.memory_space<vmem>>, %arg3: memref<8x1xf32, #tpu.memory_space<vmem>>, %arg4: memref<1x1xf32, #tpu.memory_space<vmem>>, %arg5: memref<1x1xf32, #tpu.memory_space<vmem>>) attributes {dimension_semantics = [#tpu.dimension_semantics<arbitrary>], iteration_bounds = array<i64: 3>, scalar_prefetch = 0 : i64, scratch_operands = 1 : i64, tpu.core_type = #tpu.core_type<tc>, window_params = [{transform_indices = @transform_0, window_bounds = array<i64: 8, 32>}, {transform_indices = @transform_1, window_bounds = array<i64: 8, 32>}, {transform_indices = @transform_2, window_bounds = array<i64: 8, 1>}, {pipeline_mode = #tpu.pipeline_mode<synchronous>, transform_indices = @transform_3, window_bounds = array<i64: 1, 1>}]} {
    %c0_i32 = arith.constant 0 : i32
    %0 = arith.cmpi eq, %arg0, %c0_i32 : i32
    %1 = arith.extui %0 : i1 to i32
    %c0_i32_0 = arith.constant 0 : i32
    %2 = arith.cmpi ne, %1, %c0_i32_0 : i32
    scf.if %2 {
      %cst_17 = arith.constant 0.000000e+00 : f32
      %42 = vector.broadcast %cst_17 : f32 to vector<1x1xf32>
      %c0_18 = arith.constant 0 : index
      %c0_19 = arith.constant 0 : index
      %43 = vector.load %arg5[%c0_18, %c0_19] : memref<1x1xf32, #tpu.memory_space<vmem>>, vector<1x1xf32>
      tpu.vector_store %arg5[%c0_18, %c0_19], %42 {strides = array<i32>} : memref<1x1xf32, #tpu.memory_space<vmem>>, vector<1x1xf32>,
    } else {
    }
    %c0 = arith.constant 0 : index
    %c0_1 = arith.constant 0 : index
    %3 = vector.load %arg1[%c0, %c0_1] : memref<8x32xf32, #tpu.memory_space<vmem>>, vector<8x32xf32>
    %c0_2 = arith.constant 0 : index
    %c0_3 = arith.constant 0 : index
    %4 = vector.load %arg2[%c0_2, %c0_3] : memref<8x32xf32, #tpu.memory_space<vmem>>, vector<8x32xf32>
    %c0_4 = arith.constant 0 : index
    %c0_5 = arith.constant 0 : index
    %5 = vector.load %arg3[%c0_4, %c0_5] : memref<8x1xf32, #tpu.memory_space<vmem>>, vector<8x1xf32>
    %6 = arith.mulf %3, %4 : vector<8x32xf32>
    %cst = arith.constant dense<0.000000e+00> : vector<8xf32>
    %7 = vector.multi_reduction <add>, %6, %cst [1] : vector<8x32xf32> to vector<8xf32>
    %8 = vector.shape_cast %7 : vector<8xf32> to vector<8x1xf32>
    %c8_i32 = arith.constant 8 : i32
    %9 = arith.muli %arg0, %c8_i32 : i32
    %10 = tpu.iota {dimensions = array<i32: 0>} : vector<8x1xi32>
    %11 = vector.broadcast %9 : i32 to vector<8x1xi32>
    %12 = arith.addi %11, %10 : vector<8x1xi32>
    %c20_i32 = arith.constant 20 : i32
    %13 = vector.broadcast %c20_i32 : i32 to vector<8x1xi32>
    %14 = arith.cmpi slt, %12, %13 : vector<8x1xi32>
    %cst_6 = arith.constant 0.000000e+00 : f32
    %15 = vector.broadcast %cst_6 : f32 to vector<8x1xf32>
    %16 = arith.select %14, %8, %15 : vector<8x1xi1>, vector<8x1xf32>
    %cst_7 = arith.constant 0.000000e+00 : f32
    %17 = vector.broadcast %cst_7 : f32 to vector<8x1xf32>
    %18 = arith.select %14, %5, %17 : vector<8x1xi1>, vector<8x1xf32>
    %cst_8 = arith.constant 0.000000e+00 : f32
    %19 = vector.broadcast %cst_8 : f32 to vector<8x1xf32>
    %20 = arith.maximumf %16, %19 : vector<8x1xf32>
    %21 = arith.mulf %16, %18 : vector<8x1xf32>
    %22 = arith.subf %20, %21 : vector<8x1xf32>
    %23 = math.absf %16 : vector<8x1xf32>
    %cst_9 = arith.constant 0.000000e+00 : f32
    %24 = vector.broadcast %cst_9 : f32 to vector<8x1xf32>
    %25 = arith.subf %24, %23 : vector<8x1xf32>
    %26 = math.exp %25 : vector<8x1xf32>
    %27 = math.log1p %26 : vector<8x1xf32>
    %28 = arith.addf %22, %27 : vector<8x1xf32>
    %cst_10 = arith.constant 0.000000e+00 : f32
    %29 = vector.broadcast %cst_10 : f32 to vector<8x1xf32>
    %30 = arith.select %14, %28, %29 : vector<8x1xi1>, vector<8x1xf32>
    %c0_11 = arith.constant 0 : index
    %c0_12 = arith.constant 0 : index
    %31 = vector.load %arg5[%c0_11, %c0_12] : memref<1x1xf32, #tpu.memory_space<vmem>>, vector<1x1xf32>
    %32 = vector.shape_cast %30 : vector<8x1xf32> to vector<1x8x1xf32>
    %cst_13 = arith.constant dense<0.000000e+00> : vector<1xf32>
    %33 = vector.multi_reduction <add>, %32, %cst_13 [1, 2] : vector<1x8x1xf32> to vector<1xf32>
    %34 = vector.shape_cast %33 : vector<1xf32> to vector<1x1x1xf32>
    %35 = vector.extract %34[0, 0, 0] : f32 from vector<1x1x1xf32>
    %36 = vector.broadcast %35 : f32 to vector<1x1xf32>
    %37 = arith.addf %31, %36 : vector<1x1xf32>
    %c0_14 = arith.constant 0 : index
    %c0_15 = arith.constant 0 : index
    %38 = vector.load %arg5[%c0_14, %c0_15] : memref<1x1xf32, #tpu.memory_space<vmem>>, vector<1x1xf32>
    tpu.vector_store %arg5[%c0_14, %c0_15], %37 {strides = array<i32>} : memref<1x1xf32, #tpu.memory_space<vmem>>, vector<1x1xf32>,
    %c2_i32 = arith.constant 2 : i32
    %39 = arith.cmpi eq, %arg0, %c2_i32 : i32
    %40 = arith.extui %39 : i1 to i32
    %c0_i32_16 = arith.constant 0 : i32
    %41 = arith.cmpi ne, %40, %c0_i32_16 : i32
    scf.if %41 {
      %c0_17 = arith.constant 0 : index
      %c0_18 = arith.constant 0 : index
      %42 = vector.load %arg5[%c0_17, %c0_18] : memref<1x1xf32, #tpu.memory_space<vmem>>, vector<1x1xf32>
      %cst_19 = arith.constant 5.000000e-02 : f32
      %43 = vector.broadcast %cst_19 : f32 to vector<1x1xf32>
      %44 = arith.mulf %42, %43 : vector<1x1xf32>
      %c0_20 = arith.constant 0 : index
      %c0_21 = arith.constant 0 : index
      %45 = vector.load %arg4[%c0_20, %c0_21] : memref<1x1xf32, #tpu.memory_space<vmem>>, vector<1x1xf32>
      tpu.vector_store %arg4[%c0_20, %c0_21], %44 {strides = array<i32>} : memref<1x1xf32, #tpu.memory_space<vmem>>, vector<1x1xf32>,
    } else {
    }
    return
  }
  func.func @transform_0(%arg0: i32) -> (i32, i32) {
    %c0_i32 = arith.constant 0 : i32
    %c0_i32_0 = arith.constant 0 : i32
    return %arg0, %c0_i32 : i32, i32
  }
  func.func @transform_1(%arg0: i32) -> (i32, i32) {
    %c0_i32 = arith.constant 0 : i32
    %c0_i32_0 = arith.constant 0 : i32
    return %arg0, %c0_i32 : i32, i32
  }
  func.func @transform_2(%arg0: i32) -> (i32, i32) {
    %c0_i32 = arith.constant 0 : i32
    %c0_i32_0 = arith.constant 0 : i32
    return %arg0, %c0_i32 : i32, i32
  }
  func.func @transform_3(%arg0: i32) -> (i32, i32) {
    %c0_i32 = arith.constant 0 : i32
    %c0_i32_0 = arith.constant 0 : i32
    %c0_i32_1 = arith.constant 0 : i32
    return %c0_i32, %c0_i32_0 : i32, i32
  }
}

</mosaic_0001>

<bundles_post_ra>
// kernel: tpu_custom_call.1
= control target key start
LH: loop header
LB: loop body
LE: loop exit
PB: predicated region body
PF: predicated region fallthrough
CT: control target
= control target key end

     0   :  { %8 = vsyncpa [#allocation4], 0  ;;  %s679_s0 = inlined_call_operand.vmem [shape: f32[20,32], index: 0, kind: input, shape index: {}]   ;;  %s680_s1 = inlined_call_operand.hbm [shape: f32[20,32], index: 1, kind: input, shape index: {}]   ;;  %s681_s2 = inlined_call_operand.vmem [shape: f32[20,1], index: 2, kind: input, shape index: {}]   ;;  %s682_s3 = inlined_call_operand.hbm [shape: f32[1,1], index: 3, kind: output, shape index: {}]  }
   0x1   :  { %10 = vsyncpa [#allocation4 + $0x1], 0 }
   0x2   :  { %11 = vsyncpa [#allocation5], 0  ;;  %s540_s12 = smov 0   ;;  %s542_s13 = smov 0  }
   0x3   :  { %s544_s14 = smov 0   ;;  %s546_s15 = smov 0  }
   0x4 LB: > { %s559_s16 = sadd.s32 4294967295, %s515_s15   ;;  %s562_s17 = sadd.s32 1, %s515_s15   ;;  %s515_s15 = sphi %s546_s15, %s690_s15   ;;  %s511_s14 = sphi %s544_s14, %s689_s14   ;;  %s507_s13 = sphi %s542_s13, %s688_s13   ;;  %s503_s12 = sphi %s540_s12, %s687_s12  }
   0x5   : > { %s47_s18 = ssub.s32 %s515_s15, %s562_s17  ;;  %s50_s19 = sadd.s32 1, %s511_s14 }
   0x6   : > { %p48_p0 = scmp.eq.s32.totalorder %s47_s18, 0  ;;  %p57_p1 = scmp.ne.s32.totalorder %s511_s14, %s507_s13 }
   0x7   : > { %p58_p2 = scmp.eq.s32.totalorder %s515_s15, 0  ;;  %p63_p3 = scmp.ne.s32.totalorder %s507_s13, %s503_s12 }
   0x8   : > { %s572_s20 = scalar_select %p48_p0, %s511_s14, %s50_s19  }
   0x9   : > { %p59_p4 = por %p58_p2, %p57_p1  ;;  %p64_p5 = scmp.eq.s32.totalorder %s559_s16, 0 }
   0xa   : > { %p380_p6 = scmp.lt.s32.totalorder %s515_s15, 3  ;;  %s141_s22 = sand.u32 1, %s511_s14  }
   0xb   : > { %p576_p7 = por %p64_p5, %p63_p3  ;;  %s355_s23 = sshll.u32 %s141_s22, 3 }
   0xc   : > { %s356_s24 = sshll.u32 %s515_s15, 7  ;;  %s145_s28 = scalar_lea.vmem [#allocation3], %s355_s23 }
   0xd   : > { %s585_s27 = scalar_lea.hbm %s680_s1, %s356_s24  ;;  %s152_s29 = sshll.u32 %s145_s28, 4  ;;  %s587_s29 = int_to_ptr.vmem [resolvable:$true] %s152_s29 }
   0xe   : > { %p589_p8 = pnand %p380_p6, %p59_p4  ;;  %s142_s4 = scalar_lea.sflag [#allocation4], %s141_s22 }
   0xf   : > { %s421_s5 = scalar_lea.hbm %s585_s27, 128  ;;  %s426_s8 = scalar_lea.hbm %s680_s1, 384 }
  0x10   : > { %p422_p11 = scmp.ne.s32.totalorder %s585_s27, %s421_s5  ;;  %p423_p12 = pneg %p589_p8 }
  0x11   : > { %p427_p1 = scmp.lt.u32.totalorder %s585_s27, %s680_s1  ;;  %p428_p2 = scmp.lt.u32.totalorder %s426_s8, %s421_s5 }
  0x12   : > { %p424_p13 = pnand %p423_p12, %p422_p11  ;;  %p430_p4 = scmp.lt.u32.totalorder %s421_s5, %s585_s27 }
  0x13   : > { %p429_p3 = por %p428_p2, %p427_p1 }
  0x14   : > { %p425_p0 = pneg %p424_p13 }
  0x15   : > { %p431_p5 = por %p430_p4, %p429_p3 }
  0x17   : > { %p432_p6 = pnand %p431_p5, %p425_p0 }
  0x19   : > { %435 = shalt.err (!%p432_p6)
}
  0x1a   : > { %s436_s11 = scalar_lea.vmem %s587_s29, 128  ;;  %s517_s12 = smov [#allocation3]  }
  0x1b   : > { %p437_p11 = scmp.ne.s32.totalorder %s587_s29, %s436_s11  ;;  %s441_s18 = sshll.u32 %s517_s12, 4  ;;  %s442_s18 = int_to_ptr.vmem [resolvable:$false] %s441_s18 }
  0x1c   : > { %s443_s19 = scalar_lea.vmem %s442_s18, 256  ;;  %p444_p10 = scmp.lt.s32.totalorder %s587_s29, %s442_s18 }
  0x1d   : > { %p439_p13 = pnand %p437_p11, %p423_p12  ;;  %p445_p1 = scmp.lt.s32.totalorder %s443_s19, %s436_s11 }
  0x1f   : > { %p440_p9 = pneg %p439_p13  ;;  %p446_p2 = por %p445_p1, %p444_p10 }
  0x21   : > { %p447_p3 = pnand %p446_p2, %p440_p9 }
  0x23   : > { %450 = shalt.err (!%p447_p3)
}
  0x24   : > { %379 = dma.hbm_to_vmem [thread:$0]  (!%p589_p8), %s585_s27, 128, %s587_s29, %s142_s4  }
  0x25   : > { %p685_p0 = scmp.lt.s32.totalorder %s515_s15, 4  ;;  %p686_p4 = scmp.ge.s32.totalorder %s515_s15, 1 }
  0x27   : > { %p165_p12 = pnand %p686_p4, %p685_p0 }
  0x28   : > { %s170_s22 = sand.u32 (!%p165_p12), 1, %s507_s13  }
  0x29   : > { %168 = sbr.rel (%p165_p12) target bundleno = 487 (0x1e7), region = 32  ;;  %s358_s23 = sshll.u32 (!%p165_p12), %s170_s22, 3 }
  0x2a   : > { %s171_s24 = scalar_lea.sflag (!%p165_p12), [#allocation4], %s170_s22  ;;  %s174_s25 = scalar_lea.vmem (!%p165_p12), [#allocation3], %s358_s23 }
  0x30   : > { %494 = dma.done.wait (%p576_p7), %s171_s24, 128  }
  0x31   : > { %496 = vsyncadd (%p576_p7), %s171_s24, 4294967168  ;;  %p200_p9 = scmp.lt.s32.totalorder %s559_s16, 2  ;;  %p361_p8 = scmp.ne.s32.totalorder %s559_s16, 0 }
  0x32   : > { %vm212_vm0 = vcmask (!%p361_p8), 0   ;;  %v518_v0 = vmov (!%p361_p8), 0.0  }
  0x33   : > { %s201_s26 = scalar_select %p200_p9, %s559_s16, 2 }
  0x34   : > { %211 = sbr.rel (%p361_p8) target bundleno = 59 (0x3b), region = 40  ;;  %213 = vst.msk [vmem:[#allocation2] sm:$0x1] (!%p361_p8), %vm212_vm0, %v518_v0 }
  0x35   : > { %s359_s27 = sshll.u32 %s201_s26, 3 }
  0x36   : > { %s203_s29 = scalar_lea.vmem %s679_s0, %s359_s27  ;;  %s207_s5 = scalar_lea.vmem %s681_s2, %s359_s27 }
  0x3b PF: > { %v214_v1 = vld [vmem:[%s203_s29] sm:$0xff]  ;;  %vm218_vm1 = vcmask 261120   ;;  %v223_v5 = vlaneseq  ;;  %s362_s21 = sshll.u32 %s559_s16, 3  ;;  %vm249_vm4 = vcmask 7168   ;;  %vm262_vm5 = vcmask 0   ;;  %p363_p7 = scmp.ne.s32.totalorder %s559_s16, 2 }
  0x3c   : > { %v215_v2 = vld [vmem:[%s174_s25] sm:$0xff]  ;;  %v225_v7 = vstv %s362_s21  ;;  %v248_v38 = vld [vmem:[#allocation2] sm:$0x1] }
  0x3d   : > { %v217_v3 = vmul.f32 %v215_v2, %v214_v1  ;;  %v224_v6 = vshrl.u32 %v223_v5, 7  ;;  %v216_v16 = vld [vmem:[%s207_s5] sm:$0xff] }
  0x3f   : > { %v219_v4 = vsel %vm218_vm1, %v217_v3, 0.0  ;;  %v226_v8 = vadd.s32 %v225_v7, %v224_v6 }
  0x40   : > { %220 = vadd.xlane.f32.xlu0 %v219_v4 }
  0x41   : > { %vm227_vm2 = vcmp.lt.s32.totalorder %v226_v8, 20 }
  0x42   : > { %v229_v18 = vsel %vm227_vm2, %v216_v16, 0.0 }
  0xcd   : > { %v221_v9 = vpop.xlane.xlu0 %220 }
  0xce   : > { %v228_v10 = vsel %vm227_vm2, %v221_v9, 0.0 }
  0xcf   : > { %v233_v11 = vand.u32 2147483647, %v228_v10  ;;  %v230_v20 = vmax.f32 %v228_v10, 0.0  ;;  %v231_v21 = vmul.f32 %v229_v18, %v228_v10 }
  0xd1   : > { %v234_v12 = vsub.f32 0.0, %v233_v11  ;;  %v232_v26 = vsub.f32 %v230_v20, %v231_v21 }
  0xd3   : > { %v235_v13 = vmul.f32 1.442695, %v234_v12 }
  0xd5   : > { %417 = vpow2.f32 %v235_v13 }
  0xdf   : > { %v418_v14 = vpop.eup %417 }
  0xe0   : > { %v237_v15 = vadd.f32 1.0, %v418_v14  ;;  %v240_v17 = vmul.f32 -0.5, %v418_v14  ;;  %v243_v22 = vand.u32 2147483647, %v418_v14 }
  0xe2   : > { %419 = vlog2.f32 %v237_v15  ;;  %v241_v19 = vadd.f32 1.0, %v240_v17  ;;  %vm244_vm3 = vcmp.lt.f32.partialorder %v243_v22, 0.0004427343 }
  0xe4   : > { %v242_v25 = vmul.f32 %v418_v14, %v241_v19 }
  0xec   : > { %v420_v23 = vpop.eup %419 }
  0xed   : > { %v239_v24 = vmul.f32 0.6931472, %v420_v23 }
  0xef   : > { %v245_v27 = vsel %vm244_vm3, %v242_v25, %v239_v24 }
  0xf0   : > { %v246_v28 = vadd.f32 %v245_v27, %v232_v26 }
  0xf2   : > { %v247_v29 = vsel %vm227_vm2, %v246_v28, 0.0 }
  0xf3   : > { %v250_v30 = vsel %vm249_vm4, %v247_v29, 0.0 }
  0xf4   : > { %251 = vadd.xlane.f32.xlu0 %v250_v30 }
 0x181   : > { %v252_v31 = vpop.xlane.xlu0 %251 }
 0x182   : > { %v253_v32 = vrot.slane %v252_v31, 4 }
 0x184   : > { %v254_v33 = vadd.f32 %v253_v32, %v252_v31 }
 0x186   : > { %v255_v34 = vrot.slane %v254_v33, 2 }
 0x188   : > { %v256_v35 = vadd.f32 %v255_v34, %v254_v33 }
 0x18a   : > { %v257_v36 = vrot.slane %v256_v35, 1 }
 0x18c   : > { %v258_v37 = vadd.f32 %v257_v36, %v256_v35 }
 0x18e   : > { %368 = vpush %v258_v37 }
 0x1bd   : > { %267 = sbr.rel (%p363_p7) target bundleno = 462 (0x1ce), region = 44 }
 0x1bf   : > { %s369_s6 = spop %368 }
 0x1c0   : > { %v260_v39 = vstv %s369_s6 }
 0x1c1   : > { %v261_v40 = vadd.f32 %v260_v39, %v248_v38 }
 0x1c3   : > { %263 = vst.msk [vmem:[#allocation2] sm:$0x1] %vm262_vm5, %v261_v40 }
 0x1ca   : > { %v268_v41 = vld [vmem:[#allocation2] sm:$0x1] }
 0x1cb   : > { %v269_v42 = vmul.f32 0.05, %v268_v41 }
 0x1cd   : > { %270 = vst.msk [vmem:[#allocation6] sm:$0x1] %vm262_vm5, %v269_v42 }
 0x1ce PF: > { %p381_p10 = scmp.eq.s32.totalorder %s559_s16, 2  ;;  %s519_s7 = smov [#allocation6]  }
 0x1cf   : > { %s278_s8 = sshll.u32 %s519_s7, 4  ;;  %s279_s8 = int_to_ptr.vmem [resolvable:$true] %s278_s8 }
 0x1d0   : > { %s451_s9 = scalar_lea.vmem %s279_s8, 16  ;;  %s457_s10 = scalar_lea.vmem %s279_s8, 32 }
 0x1d1   : > { %p452_p5 = scmp.ne.s32.totalorder %s279_s8, %s451_s9  ;;  %p458_p13 = scmp.lt.s32.totalorder %s279_s8, %s279_s8 }
 0x1d2   : > { %p459_p1 = scmp.lt.s32.totalorder %s457_s10, %s451_s9 }
 0x1d3   : > { %p453_p6 = pnand %p452_p5, %p381_p10 }
 0x1d4   : > { %p460_p2 = por %p459_p1, %p458_p13 }
 0x1d5   : > { %p454_p11 = pneg %p453_p6 }
 0x1d7   : > { %p461_p3 = pnand %p460_p2, %p454_p11 }
 0x1d9   : > { %464 = shalt.err (!%p461_p3)
}
 0x1da   : > { %s465_s18 = scalar_lea.hbm %s682_s3, 16 }
 0x1db   : > { %p466_p0 = scmp.ne.s32.totalorder %s682_s3, %s465_s18  ;;  %p471_p9 = scmp.lt.u32.totalorder %s465_s18, %s682_s3 }
 0x1dd   : > { %p467_p4 = pnand %p466_p0, %p381_p10 }
 0x1df   : > { %p468_p12 = pneg %p467_p4 }
 0x1e1   : > { %p473_p8 = pnand %p471_p9, %p468_p12 }
 0x1e3   : > { %476 = shalt.err (!%p473_p8)
}
 0x1e4   : > { %373 = dma.vmem_to_hbm [thread:$0]  (%p381_p10), %s279_s8, 16, %s682_s3, [#allocation5]  }
 0x1e5   : > { %498 = dma.done.wait (%p381_p10), [#allocation5], 16  }
 0x1e6   : > { %500 = vsyncadd (%p381_p10), [#allocation5], 4294967280 }
 0x1e7 PF: > { %p14_p7 = scmp.ge.s32.totalorder %s562_s17, 5   ;;  %s687_s12 = smov %s507_s13 }
 0x1e8   : > { %s688_s13 = smov %s511_s14  ;;  %s689_s14 = smov %s572_s20 }
 0x1e9   : > { %s690_s15 = smov %s562_s17  ;;  %16 = sbr.rel (!%p14_p7) target bundleno = 4 (0x4), region = 83 }
 0x1f0   :  { %291 = vsyncpa [#allocation4], 1 }
 0x1f1   :  { %293 = vsyncpa [#allocation4 + $0x1], 1 }
 0x1f2   :  { %294 = vsyncpa [#allocation5], 1 }
 0x1f3   :  { %296 = vsyncpa [#allocation5 + $0x1], 1 }

</bundles_post_ra>
